<compile_context>
chip_gen: v6e
topology: v6e:2x2x1
jax: 0.10.0
libtpu: 0.0.40
codegen_flags: <defaults>
</compile_context>

<pallas_src>
import jax
import jax.numpy as jnp
import numpy as np
from jax.experimental import pallas as pl
from jax.experimental.pallas import tpu as pltpu


# ----------------------------------------------------------------------------
# Pallas kernel: relu(W3 @ relu(W2 @ relu(W1 @ x + b1) + b2) + b3)
# ----------------------------------------------------------------------------
def hsi3d_kernel(x_ref, w1_ref, b1_ref, w2_ref, b2_ref, w3_ref, b3_ref, o_ref):
    cdt = w1_ref.dtype                       # compute dtype (bf16 or f32)
    x = x_ref[...].astype(cdt)               # (C, TN), cast in VMEM (no HBM pass)

    h1 = jnp.dot(w1_ref[...], x, preferred_element_type=jnp.float32) + b1_ref[...]
    h1 = jnp.maximum(h1, 0.0)

    h2 = jnp.dot(w2_ref[...], h1.astype(cdt),
                 preferred_element_type=jnp.float32) + b2_ref[...]
    h2 = jnp.maximum(h2, 0.0)

    h3 = jnp.dot(w3_ref[...], h2.astype(cdt),
                 preferred_element_type=jnp.float32) + b3_ref[...]
    o_ref[...] = jnp.maximum(h3, 0.0).astype(o_ref.dtype)


def hsi3d_pallas(x, dense_params, *, tile_n=4096, compute_dtype=jnp.bfloat16):
    """x: (B, C, H, W) float32. Returns (B, C_out, H, W) float32."""
    (w1d, b1d), (w2d, b2d), (w3d, b3d) = dense_params
    B, C, H, W = x.shape
    HW = H * W
    f1p, f2p, f3 = w1d.shape[0], w2d.shape[0], w3d.shape[0]

    # Lane-aligned pixel tile: multiple of 128, no larger than needed.
    hw_128 = ((HW + 127) // 128) * 128
    tile = min(int(tile_n), hw_128)
    HW_pad = ((HW + tile - 1) // tile) * tile

    # Free view (no transpose): pixels go on the lane axis.
    x3 = x.reshape(B, C, HW)
    if HW_pad != HW:
        x3 = jnp.pad(x3, ((0, 0), (0, 0), (0, HW_pad - HW)))

    # Weights are tiny -> pre-cast once; biases stay f32 (added post-matmul).
    w1c = w1d.astype(compute_dtype)
    w2c = w2d.astype(compute_dtype)
    w3c = w3d.astype(compute_dtype)

    grid = (B, HW_pad // tile)

    out = pl.pallas_call(
        hsi3d_kernel,
        out_shape=jax.ShapeDtypeStruct((B, f3, HW_pad), jnp.float32),
        grid_spec=pltpu.PrefetchScalarGridSpec(
            num_scalar_prefetch=0,
            grid=grid,
            in_specs=[
                # x tile: batch dim squeezed, (C, tile) in the kernel.
                pl.BlockSpec((None, C, tile), lambda b, j: (b, 0, j)),
                pl.BlockSpec((f1p, C), lambda b, j: (0, 0)),     # W1 (full)
                pl.BlockSpec((f1p, 1), lambda b, j: (0, 0)),     # b1
                pl.BlockSpec((f2p, f1p), lambda b, j: (0, 0)),   # W2
                pl.BlockSpec((f2p, 1), lambda b, j: (0, 0)),     # b2
                pl.BlockSpec((f3, f2p), lambda b, j: (0, 0)),    # W3
                pl.BlockSpec((f3, 1), lambda b, j: (0, 0)),      # b3
            ],
            out_specs=pl.BlockSpec((None, f3, tile), lambda b, j: (b, 0, j)),
        ),
        compiler_params=pltpu.CompilerParams(
            dimension_semantics=("parallel", "parallel"),
        ),
    )(x3, w1c, b1d, w2c, b2d, w3c, b3d)

    if HW_pad != HW:
        out = out[:, :, :HW]                 # drop padded pixel columns
    return out.reshape(B, f3, H, W)          # free reshape back to NCHW


# ----------------------------------------------------------------------------
# Parameter setup (host-side, once): fold Conv3d((K,1,1), stride=(s,1,1)) into
# a dense matrix over the flattened spectral-feature axis, zero-padded to
# sublane-friendly shapes.
# ----------------------------------------------------------------------------
def conv_to_dense(w, b, d_in, stride, in_features, pad_rows_to=8):
    """w: (OC, IC, K) spectral conv weight.

    Returns (W_dense, bias_col, d_out, rows, rows_padded) where W_dense has
    shape (rows_padded, in_features).  Columns beyond IC*d_in and rows beyond
    OC*d_out are zero (so padded activation rows stay exactly zero).
    """
    oc, ic, k = w.shape
    d_out = (d_in - k) // stride + 1
    rows = oc * d_out
    rows_pad = ((rows + pad_rows_to - 1) // pad_rows_to) * pad_rows_to
    assert in_features >= ic * d_in
    m = np.zeros((rows_pad, in_features), dtype=np.float32)
    w_np = np.asarray(w, dtype=np.float32)
    for o in range(oc):
        for d in range(d_out):
            for i in range(ic):
                col0 = i * d_in + stride * d
                m[o * d_out + d, col0:col0 + k] = w_np[o, i]
    b_full = np.zeros((rows_pad, 1), dtype=np.float32)
    b_full[:rows, 0] = np.repeat(np.asarray(b, dtype=np.float32), d_out)
    return jnp.asarray(m), jnp.asarray(b_full), d_out, rows, rows_pad


def make_params(key, C):
    # Conv3d(1,10,(5,1,1),stride=(2,1,1)); Conv3d(10,5,(5,1,1)); Conv3d(5,1,(5,1,1))
    k1, k2, k3, k4, k5, k6 = jax.random.split(key, 6)
    w1 = jax.random.normal(k1, (10, 1, 5), jnp.float32) * 0.2
    b1 = jax.random.normal(k2, (10,), jnp.float32) * 0.05
    w2 = jax.random.normal(k3, (5, 10, 5), jnp.float32) * 0.1
    b2 = jax.random.normal(k4, (5,), jnp.float32) * 0.05
    w3 = jax.random.normal(k5, (1, 5, 5), jnp.float32) * 0.1
    b3 = jax.random.normal(k6, (1,), jnp.float32) * 0.05

    w1d, b1d, d1, _, f1p = conv_to_dense(w1, b1, C, 2, in_features=C, pad_rows_to=8)
    w2d, b2d, d2, _, f2p = conv_to_dense(w2, b2, d1, 1, in_features=f1p, pad_rows_to=8)
    # Final layer: keep 3 output rows unpadded (lean HBM writeback, no extra slice).
    w3d, b3d, d3, _, _ = conv_to_dense(w3, b3, d2, 1, in_features=f2p, pad_rows_to=1)

    raw = (w1, b1, w2, b2, w3, b3)
    dense = ((w1d, b1d), (w2d, b2d), (w3d, b3d))
    return raw, dense


# ----------------------------------------------------------------------------
# Pure-JAX reference (mirrors PyTorch Conv3d (K,1,1) semantics exactly)
# ----------------------------------------------------------------------------
def ref_forward(x, raw):
    w1, b1, w2, b2, w3, b3 = raw

    def conv_spectral(h, w, b, stride):
        # h: (B, IC, D, H, W); w: (OC, IC, K)
        oc, ic, k = w.shape
        d_in = h.shape[2]
        d_out = (d_in - k) // stride + 1
        outs = []
        for d in range(d_out):
            sl = h[:, :, stride * d:stride * d + k]            # (B, IC, K, H, W)
            outs.append(jnp.einsum("bikhw,oik->bohw", sl, w))
        out = jnp.stack(outs, axis=2)                          # (B, OC, D_out, H, W)
        return out + b[None, :, None, None, None]

    h = x[:, None]                                             # unsqueeze(dim=1)
    h = jnp.maximum(conv_spectral(h, w1, b1, 2), 0.0)
    h = jnp.maximum(conv_spectral(h, w2, b2, 1), 0.0)
    h = jnp.maximum(conv_spectral(h, w3, b3, 1), 0.0)
    return h[:, 0]                                             # squeeze(dim=1)


if __name__ == "__main__":
    key = jax.random.PRNGKey(0)
    kx, kp = jax.random.split(key)

    # Small shapes consistent with the module: B=2, spectral C=25, spatial 8x8.
    # Spectral dims: 25 -conv1(s2)-> 11 -conv2-> 7 -conv3-> 3 output channels.
    B, C, H, W = 2, 25, 8, 8
    x = jax.random.uniform(kx, (B, C, H, W), jnp.float32)

    raw, dense = make_params(kp, C)
    ref = jax.block_until_ready(ref_forward(x, raw))

    # Strict correctness check on the float32 compute path.
    out_f32 = jax.block_until_ready(
        hsi3d_pallas(x, dense, compute_dtype=jnp.float32))
    assert out_f32.shape == ref.shape, (out_f32.shape, ref.shape)
    np.testing.assert_allclose(np.asarray(out_f32), np.asarray(ref),
                               rtol=1e-5, atol=1e-5)

    # Default bf16-matmul path (MXU-friendly on v5e/v6e/v7x): loose sanity check.
    out_bf16 = jax.block_until_ready(hsi3d_pallas(x, dense))
    assert out_bf16.shape == ref.shape, (out_bf16.shape, ref.shape)
    max_err = float(np.max(np.abs(np.asarray(out_bf16) - np.asarray(ref))))
    assert max_err < 0.25, f"bf16 path max abs error too large: {max_err}"

    print("KERNEL_OK")
</pallas_src>

<mosaic_0001>
module attributes {stable_mosaic.version = 11 : i64} {
  func.func @hsi3d_kernel(%arg0: i32, %arg1: i32, %arg2: memref<1x25x128xf32, #tpu.memory_space<vmem>>, %arg3: memref<112x25xf32, #tpu.memory_space<vmem>>, %arg4: memref<112x1xf32, #tpu.memory_space<vmem>>, %arg5: memref<40x112xf32, #tpu.memory_space<vmem>>, %arg6: memref<40x1xf32, #tpu.memory_space<vmem>>, %arg7: memref<3x40xf32, #tpu.memory_space<vmem>>, %arg8: memref<3x1xf32, #tpu.memory_space<vmem>>, %arg9: memref<1x3x128xf32, #tpu.memory_space<vmem>>) attributes {dimension_semantics = [#tpu.dimension_semantics<parallel>, #tpu.dimension_semantics<parallel>], iteration_bounds = array<i64: 2, 1>, scalar_prefetch = 0 : i64, scratch_operands = 0 : i64, tpu.core_type = #tpu.core_type<tc>, window_params = [{transform_indices = @transform_0, window_bounds = array<i64: 1, 25, 128>}, {pipeline_mode = #tpu.pipeline_mode<synchronous>, transform_indices = @transform_1, window_bounds = array<i64: 112, 25>}, {pipeline_mode = #tpu.pipeline_mode<synchronous>, transform_indices = @transform_2, window_bounds = array<i64: 112, 1>}, {pipeline_mode = #tpu.pipeline_mode<synchronous>, transform_indices = @transform_3, window_bounds = array<i64: 40, 112>}, {pipeline_mode = #tpu.pipeline_mode<synchronous>, transform_indices = @transform_4, window_bounds = array<i64: 40, 1>}, {pipeline_mode = #tpu.pipeline_mode<synchronous>, transform_indices = @transform_5, window_bounds = array<i64: 3, 40>}, {pipeline_mode = #tpu.pipeline_mode<synchronous>, transform_indices = @transform_6, window_bounds = array<i64: 3, 1>}, {transform_indices = @transform_7, window_bounds = array<i64: 1, 3, 128>}]} {
    %c0 = arith.constant 0 : index
    %c0_0 = arith.constant 0 : index
    %c0_1 = arith.constant 0 : index
    %0 = vector.load %arg2[%c0, %c0_0, %c0_1] : memref<1x25x128xf32, #tpu.memory_space<vmem>>, vector<1x25x128xf32>
    %1 = vector.shape_cast %0 : vector<1x25x128xf32> to vector<25x128xf32>
    %c0_2 = arith.constant 0 : index
    %c0_3 = arith.constant 0 : index
    %2 = vector.load %arg3[%c0_2, %c0_3] : memref<112x25xf32, #tpu.memory_space<vmem>>, vector<112x25xf32>
    %cst = arith.constant dense<0.000000e+00> : vector<112x128xf32>
    %3 = tpu.matmul %2, %1, %cst {dimension_numbers = #tpu.dot_dimension_numbers<[1], [0], [0], [1], [0, 0, 1, 1], [], []>} : vector<112x25xf32>, vector<25x128xf32>, vector<112x128xf32> -> vector<112x128xf32>
    %c0_4 = arith.constant 0 : index
    %c0_5 = arith.constant 0 : index
    %4 = vector.load %arg4[%c0_4, %c0_5] : memref<112x1xf32, #tpu.memory_space<vmem>>, vector<112x1xf32>
    %5 = vector.broadcast %4 : vector<112x1xf32> to vector<112x128xf32>
    %6 = arith.addf %3, %5 : vector<112x128xf32>
    %cst_6 = arith.constant 0.000000e+00 : f32
    %7 = vector.broadcast %cst_6 : f32 to vector<112x128xf32>
    %8 = arith.maximumf %6, %7 : vector<112x128xf32>
    %c0_7 = arith.constant 0 : index
    %c0_8 = arith.constant 0 : index
    %9 = vector.load %arg5[%c0_7, %c0_8] : memref<40x112xf32, #tpu.memory_space<vmem>>, vector<40x112xf32>
    %cst_9 = arith.constant dense<0.000000e+00> : vector<40x128xf32>
    %10 = tpu.matmul %9, %8, %cst_9 {dimension_numbers = #tpu.dot_dimension_numbers<[1], [0], [0], [1], [0, 0, 1, 1], [], []>} : vector<40x112xf32>, vector<112x128xf32>, vector<40x128xf32> -> vector<40x128xf32>
    %c0_10 = arith.constant 0 : index
    %c0_11 = arith.constant 0 : index
    %11 = vector.load %arg6[%c0_10, %c0_11] : memref<40x1xf32, #tpu.memory_space<vmem>>, vector<40x1xf32>
    %12 = vector.broadcast %11 : vector<40x1xf32> to vector<40x128xf32>
    %13 = arith.addf %10, %12 : vector<40x128xf32>
    %cst_12 = arith.constant 0.000000e+00 : f32
    %14 = vector.broadcast %cst_12 : f32 to vector<40x128xf32>
    %15 = arith.maximumf %13, %14 : vector<40x128xf32>
    %c0_13 = arith.constant 0 : index
    %c0_14 = arith.constant 0 : index
    %16 = vector.load %arg7[%c0_13, %c0_14] : memref<3x40xf32, #tpu.memory_space<vmem>>, vector<3x40xf32>
    %cst_15 = arith.constant dense<0.000000e+00> : vector<3x128xf32>
    %17 = tpu.matmul %16, %15, %cst_15 {dimension_numbers = #tpu.dot_dimension_numbers<[1], [0], [0], [1], [0, 0, 1, 1], [], []>} : vector<3x40xf32>, vector<40x128xf32>, vector<3x128xf32> -> vector<3x128xf32>
    %c0_16 = arith.constant 0 : index
    %c0_17 = arith.constant 0 : index
    %18 = vector.load %arg8[%c0_16, %c0_17] : memref<3x1xf32, #tpu.memory_space<vmem>>, vector<3x1xf32>
    %19 = vector.broadcast %18 : vector<3x1xf32> to vector<3x128xf32>
    %20 = arith.addf %17, %19 : vector<3x128xf32>
    %cst_18 = arith.constant 0.000000e+00 : f32
    %21 = vector.broadcast %cst_18 : f32 to vector<3x128xf32>
    %22 = arith.maximumf %20, %21 : vector<3x128xf32>
    %c0_19 = arith.constant 0 : index
    %c0_20 = arith.constant 0 : index
    %c0_21 = arith.constant 0 : index
    %23 = vector.load %arg9[%c0_19, %c0_20, %c0_21] : memref<1x3x128xf32, #tpu.memory_space<vmem>>, vector<1x3x128xf32>
    %24 = vector.shape_cast %23 : vector<1x3x128xf32> to vector<3x128xf32>
    %25 = vector.shape_cast %22 : vector<3x128xf32> to vector<1x3x128xf32>
    tpu.vector_store %arg9[%c0_19, %c0_20, %c0_21], %25 {strides = array<i32>} : memref<1x3x128xf32, #tpu.memory_space<vmem>>, vector<1x3x128xf32>,
    return
  }
  func.func @transform_0(%arg0: i32, %arg1: i32) -> (i32, i32, i32) {
    %c0_i32 = arith.constant 0 : i32
    %c0_i32_0 = arith.constant 0 : i32
    return %arg0, %c0_i32, %arg1 : i32, i32, i32
  }
  func.func @transform_1(%arg0: i32, %arg1: i32) -> (i32, i32) {
    %c0_i32 = arith.constant 0 : i32
    %c0_i32_0 = arith.constant 0 : i32
    %c0_i32_1 = arith.constant 0 : i32
    return %c0_i32, %c0_i32_0 : i32, i32
  }
  func.func @transform_2(%arg0: i32, %arg1: i32) -> (i32, i32) {
    %c0_i32 = arith.constant 0 : i32
    %c0_i32_0 = arith.constant 0 : i32
    %c0_i32_1 = arith.constant 0 : i32
    return %c0_i32, %c0_i32_0 : i32, i32
  }
  func.func @transform_3(%arg0: i32, %arg1: i32) -> (i32, i32) {
    %c0_i32 = arith.constant 0 : i32
    %c0_i32_0 = arith.constant 0 : i32
    %c0_i32_1 = arith.constant 0 : i32
    return %c0_i32, %c0_i32_0 : i32, i32
  }
  func.func @transform_4(%arg0: i32, %arg1: i32) -> (i32, i32) {
    %c0_i32 = arith.constant 0 : i32
    %c0_i32_0 = arith.constant 0 : i32
    %c0_i32_1 = arith.constant 0 : i32
    return %c0_i32, %c0_i32_0 : i32, i32
  }
  func.func @transform_5(%arg0: i32, %arg1: i32) -> (i32, i32) {
    %c0_i32 = arith.constant 0 : i32
    %c0_i32_0 = arith.constant 0 : i32
    %c0_i32_1 = arith.constant 0 : i32
    return %c0_i32, %c0_i32_0 : i32, i32
  }
  func.func @transform_6(%arg0: i32, %arg1: i32) -> (i32, i32) {
    %c0_i32 = arith.constant 0 : i32
    %c0_i32_0 = arith.constant 0 : i32
    %c0_i32_1 = arith.constant 0 : i32
    return %c0_i32, %c0_i32_0 : i32, i32
  }
  func.func @transform_7(%arg0: i32, %arg1: i32) -> (i32, i32, i32) {
    %c0_i32 = arith.constant 0 : i32
    %c0_i32_0 = arith.constant 0 : i32
    return %arg0, %c0_i32, %arg1 : i32, i32, i32
  }
}

</mosaic_0001>

<bundles_post_ra>
// kernel: tpu_custom_call.1
= control target key start
LH: loop header
LB: loop body
LE: loop exit
PB: predicated region body
PF: predicated region fallthrough
CT: control target
= control target key end

     0   :  { %s1168_s24 = smov 0   ;;  %s1170_s25 = smov 0   ;;  %s1376_s0 = inlined_call_operand.vmem [shape: f32[2,25,128], index: 0, kind: input, shape index: {}]   ;;  %s1377_s1 = inlined_call_operand.vmem [shape: f32[112,25], index: 1, kind: input, shape index: {}]   ;;  %s1378_s2 = inlined_call_operand.vmem [shape: f32[112,1], index: 2, kind: input, shape index: {}]   ;;  %s1379_s3 = inlined_call_operand.vmem [shape: f32[40,112], index: 3, kind: input, shape index: {}]   ;;  %s1380_s4 = inlined_call_operand.vmem [shape: f32[40,1], index: 4, kind: input, shape index: {}]   ;;  %s1381_s5 = inlined_call_operand.vmem [shape: f32[3,40], index: 5, kind: input, shape index: {}]   ;;  %s1382_s6 = inlined_call_operand.vmem [shape: f32[3,1], index: 6, kind: input, shape index: {}]   ;;  %s1383_s7 = inlined_call_operand.vmem [shape: f32[2,3,128], index: 7, kind: output, shape index: {}]  }
   0x1   :  { %s1172_s26 = smov 0  }
   0x2 LB: > { %s29_s27 = sadd.s32 1, %s1119_s25  ;;  %p916_p0 = scmp.ge.s32.totalorder %s1123_s26, 1  ;;  %s1123_s26 = sphi %s1172_s26, %s17_s26   ;;  %s1119_s25 = sphi %s1170_s25, %s1385_s25   ;;  %s1115_s24 = sphi %s1168_s24, %s1384_s24  }
   0x3   : > { %p31_p1 = scmp.ge.s32.totalorder %s29_s27, 2  ;;  %p256_p2 = scmp.lt.s32.totalorder %s1123_s26, 3 }
   0x5   : > { %s1387_s27 = smov (%p31_p1, %s29_s27), 0  ;;  %p257_p3 = pnand %p916_p0, %p256_p2 }
   0x6   : > { %p293_p4 = scmp.lt.s32.totalorder (!%p257_p3), %s1115_s24, 1 }
   0x7   : > { %260 = sbr.rel (%p257_p3) target bundleno = 692 (0x2b4), region = 48 }
   0xc   : > { %v312_v0 = vld [vmem:[%s1377_s1] sm:$0xff]  ;;  %vm410_vm0 = vcmask 203776   ;;  %s1389_s24 = smov (!%p293_p4, %s1115_s24), 1  ;;  %v1125_v1 = vmov 0   ;;  %vm453_vm1 = vcmask 1040384   ;;  %v339_v2 = vld [vmem:[%s1378_s2 + $0x68] sm:$0xff] }
   0xd   : > { %995 = vmatprep.mubr.msk.f32.mxu0 %vm410_vm0, %v312_v0  ;;  %1099 = vset.pattern.permute.xlu0 %v1125_v1  ;;  %s943_s30 = sshll.u32 %s1389_s24, 5  ;;  %v337_v3 = vld [vmem:[%s1378_s2 + $0x58] sm:$0xff]  ;;  %v338_v6 = vld [vmem:[%s1378_s2 + $0x60] sm:$0xff]  ;;  %v336_v7 = vld [vmem:[%s1378_s2 + $0x50] sm:$0xff]  ;;  %v1126_v39 = vmov 0.0   ;;  %vm1127_vm2 = vmmov 0  }
   0xe   : > { %1100 = vset.pattern.permute.xlu1 %v1125_v1  ;;  %s300_s12 = scalar_lea.vmem %s1376_s0, %s943_s30  ;;  %407 = vperm.xlu0 %1099, %v339_v2   ;;  %v335_v10 = vld [vmem:[%s1378_s2 + $0x48] sm:$0xff]  ;;  %v334_v11 = vld [vmem:[%s1378_s2 + $0x40] sm:$0xff]  ;;  %v314_v13 = vld [vmem:[%s1377_s1 + $0x10] sm:$0xff]  ;;  %vm641_vm3 = vcmask 916480   ;;  %vm759_vm4 = vcmask 326656   ;;  %s919_s13 = sshll.u32 %s1389_s24, 2 }
   0xf   : > { %v311_v4 = vld [vmem:[%s300_s12 + $0x18] sm:$0x1]  ;;  %v310_v5 = vld [vmem:[%s300_s12 + $0x10] sm:$0xff]  ;;  %397 = vperm.xlu1 %1100, %v337_v3   ;;  %v309_v8 = vld [vmem:[%s300_s12 + $0x8] sm:$0xff]  ;;  %1016 = vmatprep.subr.mxu1 %v1126_v39  ;;  %s307_s16 = scalar_lea.vmem %s1383_s7, %s919_s13 }
  0x10   : > { %987 = vmatprep.subr.msk.mxu0 %vm453_vm1, %v311_v4  ;;  %v308_v9 = vld [vmem:[%s300_s12] sm:$0xff]  ;;  %v313_v12 = vld [vmem:[%s1377_s1 + $0x8] sm:$0xff]  ;;  %v333_v14 = vld [vmem:[%s1378_s2 + $0x38] sm:$0xff]  ;;  %1044 = vmatprep.mubr.msk.f32.mxu1 %vm1127_vm2, %v1126_v39 }
  0x11   : > { %988 = vmatpush3.msk.msra.mxu0 %vm453_vm1, %v311_v4  ;;  %v332_v15 = vld [vmem:[%s1378_s2 + $0x30] sm:$0xff]  ;;  %v315_v16 = vld [vmem:[%s1377_s1 + $0x18] sm:$0xff]  ;;  %v316_v17 = vld [vmem:[%s1377_s1 + $0x20] sm:$0xff] }
  0x12   : > { %989 = vmatprep.subr.mxu0 %v310_v5  ;;  %402 = vperm.xlu0 %1099, %v338_v6   ;;  %v331_v18 = vld [vmem:[%s1378_s2 + $0x28] sm:$0xff]  ;;  %v330_v19 = vld [vmem:[%s1378_s2 + $0x20] sm:$0xff]  ;;  %v318_v21 = vld [vmem:[%s1377_s1 + $0x30] sm:$0xff] }
  0x13   : > { %990 = vmatpush3.msra.mxu0 %v310_v5  ;;  %392 = vperm.xlu1 %1100, %v336_v7   ;;  %v317_v20 = vld [vmem:[%s1377_s1 + $0x28] sm:$0xff]  ;;  %v329_v22 = vld [vmem:[%s1378_s2 + $0x18] sm:$0xff]  ;;  %v328_v23 = vld [vmem:[%s1378_s2 + $0x10] sm:$0xff] }
  0x14   : > { %991 = vmatprep.subr.mxu0 %v309_v8  ;;  %v319_v24 = vld [vmem:[%s1377_s1 + $0x38] sm:$0xff]  ;;  %v320_v25 = vld [vmem:[%s1377_s1 + $0x40] sm:$0xff]  ;;  %v327_v26 = vld [vmem:[%s1378_s2 + $0x8] sm:$0xff] }
  0x15   : > { %992 = vmatpush3.msra.mxu0 %v309_v8  ;;  %v326_v27 = vld [vmem:[%s1378_s2] sm:$0xff]  ;;  %v321_v28 = vld [vmem:[%s1377_s1 + $0x48] sm:$0xff]  ;;  %v322_v29 = vld [vmem:[%s1377_s1 + $0x50] sm:$0xff] }
  0x16   : > { %993 = vmatprep.subr.mxu0 %v308_v9  ;;  %387 = vperm.xlu0 %1099, %v335_v10   ;;  %v615_v30 = vld [vmem:[%s1380_s4 + $0x20] sm:$0xff]  ;;  %v614_v31 = vld [vmem:[%s1380_s4 + $0x18] sm:$0xff]  ;;  %v613_v34 = vld [vmem:[%s1380_s4 + $0x10] sm:$0xff] }
  0x17   : > { %994 = vmatpush3.msra.mxu0 %v308_v9  ;;  %382 = vperm.xlu1 %1100, %v334_v11   ;;  %v323_v32 = vld [vmem:[%s1377_s1 + $0x58] sm:$0xff]  ;;  %v324_v33 = vld [vmem:[%s1377_s1 + $0x60] sm:$0xff]  ;;  %v612_v35 = vld [vmem:[%s1380_s4 + $0x8] sm:$0xff] }
  0x18   : > { %996 = vmatmul.mubr.msk.f32.vlgmr.msra.gmra.mxu0 %vm410_vm0, %v313_v12  ;;  %v325_v36 = vld [vmem:[%s1377_s1 + $0x68] sm:$0xff]  ;;  %v611_v37 = vld [vmem:[%s1380_s4] sm:$0xff]  ;;  %1059 = vmatprep.subr.mxu0 %v1126_v39 }
  0x19   : > { %998 = vmatprep.mubr.msk.f32.mxu0 %vm410_vm0, %v314_v13  ;;  %v753_v38 = vld [vmem:[%s1382_s6] sm:$0x7] }
  0x1a   : > { %377 = vperm.xlu0 %1099, %v333_v14  }
  0x1b   : > { %372 = vperm.xlu1 %1100, %v332_v15  }
  0x1c   : > { %999 = vmatmul.mubr.msk.f32.gmra.mxu0 %vm410_vm0, %v315_v16 }
  0x1d   : > { %1001 = vmatprep.mubr.msk.f32.mxu0 %vm410_vm0, %v316_v17 }
  0x1e   : > { %367 = vperm.xlu0 %1099, %v331_v18  }
  0x1f   : > { %362 = vperm.xlu1 %1100, %v330_v19  }
  0x20   : > { %1002 = vmatmul.mubr.msk.f32.gmra.mxu0 %vm410_vm0, %v317_v20 }
  0x21   : > { %1004 = vmatprep.mubr.msk.f32.mxu0 %vm410_vm0, %v318_v21 }
  0x22   : > { %357 = vperm.xlu0 %1099, %v329_v22  }
  0x23   : > { %352 = vperm.xlu1 %1100, %v328_v23  }
  0x24   : > { %1005 = vmatmul.mubr.msk.f32.gmra.mxu0 %vm410_vm0, %v319_v24 }
  0x25   : > { %1007 = vmatprep.mubr.msk.f32.mxu0 %vm410_vm0, %v320_v25 }
  0x26   : > { %347 = vperm.xlu0 %1099, %v327_v26  }
  0x27   : > { %342 = vperm.xlu1 %1100, %v326_v27  }
  0x28   : > { %1008 = vmatmul.mubr.msk.f32.gmra.mxu0 %vm410_vm0, %v321_v28 }
  0x29   : > { %1010 = vmatprep.mubr.msk.f32.mxu0 %vm410_vm0, %v322_v29 }
  0x2a   : > { %638 = vperm.xlu0 %1099, %v615_v30  }
  0x2b   : > { %633 = vperm.xlu1 %1100, %v614_v31  }
  0x2c   : > { %1011 = vmatmul.mubr.msk.f32.gmra.mxu0 %vm410_vm0, %v323_v32  ;;  %v606_v32 = vld [vmem:[%s1379_s3] sm:$0xff] }
  0x2d   : > { %1013 = vmatprep.mubr.msk.f32.mxu0 %vm410_vm0, %v324_v33  ;;  %v607_v33 = vld [vmem:[%s1379_s3 + $0x8] sm:$0xff] }
  0x2e   : > { %628 = vperm.xlu0 %1099, %v613_v34   ;;  %v608_v34 = vld [vmem:[%s1379_s3 + $0x10] sm:$0xff] }
  0x2f   : > { %623 = vperm.xlu1 %1100, %v612_v35   ;;  %v609_v35 = vld [vmem:[%s1379_s3 + $0x18] sm:$0xff] }
  0x30   : > { %1014 = vmatmul.mubr.msk.f32.gmra.mxu0 %vm410_vm0, %v325_v36  ;;  %v610_v36 = vld [vmem:[%s1379_s3 + $0x20] sm:$0xff] }
  0x31   : > { %1069 = vmatprep.mubr.msk.f32.mxu0 %vm1127_vm2, %v1126_v39 }
  0x32   : > { %618 = vperm.xlu0 %1099, %v611_v37  }
  0x33   : > { %756 = vperm.xlu1 %1100, %v753_v38  }
  0x89   : > { %v408_v44 = vpop.permute.xlu0 %407 }
  0x8a   : > { %v398_v46 = vpop.permute.xlu1 %397 }
  0x8d   : > { %v403_v49 = vpop.permute.xlu0 %402 }
  0x8e   : > { %v393_v51 = vpop.permute.xlu1 %392 }
  0x91   : > { %v388_v54 = vpop.permute.xlu0 %387 }
  0x92   : > { %v383_v56 = vpop.permute.xlu1 %382 }
  0x95   : > { %v378_v60 = vpop.permute.xlu0 %377 }
  0x96   : > { %v373_v1 = vpop.permute.xlu1 %372 }
  0x99   : > { %v368_v6 = vpop.permute.xlu0 %367 }
  0x9a   : > { %v363_v9 = vpop.permute.xlu1 %362 }
  0x9d   : > { %v358_v14 = vpop.permute.xlu0 %357 }
  0x9e   : > { %v353_v17 = vpop.permute.xlu1 %352 }
  0xa1   : > { %v348_v22 = vpop.permute.xlu0 %347 }
  0xa2   : > { %v343_v25 = vpop.permute.xlu1 %342 }
  0xd8   : > { %v1314_v40 = vpop.f32.mrf.mxu0 }
  0xd9   : > { %v529_v26 = vadd.f32 %v1314_v40, %v348_v22 }
  0xda   : > { %v1316_v41 = vpop.f32.mrf.mxu0 }
  0xdb   : > { %v524_v28 = vadd.f32 %v1316_v41, %v343_v25  ;;  %v593_v30 = vmax.f32 %v529_v26, 0.0 }
  0xdc   : > { %v1000_v42 = vpop.f32.mrf.mxu0 }
  0xdd   : > { %v539_v20 = vadd.f32 %v1000_v42, %v358_v14  ;;  %v592_v31 = vmax.f32 %v524_v28, 0.0 }
  0xde   : > { %v533_v43 = vpop.f32.mrf.mxu0 }
  0xdf   : > { %v534_v23 = vadd.f32 %v533_v43, %v353_v17  ;;  %v595_v27 = vmax.f32 %v539_v20, 0.0  ;;  %v639_v43 = vpop.permute.xlu0 %638 }
  0xe0   : > { %v1003_v45 = vpop.f32.mrf.mxu0 }
  0xe1   : > { %v549_v15 = vadd.f32 %v1003_v45, %v368_v6  ;;  %v594_v29 = vmax.f32 %v534_v23, 0.0 }
  0xe2   : > { %v543_v47 = vpop.f32.mrf.mxu0 }
  0xe3   : > { %v544_v18 = vadd.f32 %v543_v47, %v363_v9  ;;  %v597_v21 = vmax.f32 %v549_v15, 0.0 }
  0xe4   : > { %v1006_v48 = vpop.f32.mrf.mxu0 }
  0xe5   : > { %v559_v10 = vadd.f32 %v1006_v48, %v378_v60  ;;  %v596_v24 = vmax.f32 %v544_v18, 0.0  ;;  %v629_v48 = vpop.permute.xlu0 %628 }
  0xe6   : > { %v553_v50 = vpop.f32.mrf.mxu0 }
  0xe7   : > { %v554_v12 = vadd.f32 %v553_v50, %v373_v1  ;;  %v599_v16 = vmax.f32 %v559_v10, 0.0 }
  0xe8   : > { %v1009_v52 = vpop.f32.mrf.mxu0 }
  0xe9   : > { %v569_v4 = vadd.f32 %v1009_v52, %v388_v54  ;;  %v598_v19 = vmax.f32 %v554_v12, 0.0 }
  0xea   : > { %v563_v53 = vpop.f32.mrf.mxu0 }
  0xeb   : > { %v564_v7 = vadd.f32 %v563_v53, %v383_v56  ;;  %v601_v11 = vmax.f32 %v569_v4, 0.0 }
  0xec   : > { %v1012_v55 = vpop.f32.mrf.mxu0 }
  0xed   : > { %v579_v62 = vadd.f32 %v1012_v55, %v398_v46  ;;  %v600_v13 = vmax.f32 %v564_v7, 0.0  ;;  %v634_v46 = vpop.permute.xlu1 %633 }
  0xee   : > { %v573_v57 = vpop.f32.mrf.mxu0 }
  0xef   : > { %v574_v2 = vadd.f32 %v573_v57, %v393_v51  ;;  %v603_v5 = vmax.f32 %v579_v62, 0.0 }
  0xf0   : > { %v1015_v58 = vpop.f32.mrf.mxu0 }
  0xf1   : > { %v589_v59 = vadd.f32 %v1015_v58, %v408_v44  ;;  %v602_v8 = vmax.f32 %v574_v2, 0.0  ;;  %v624_v55 = vpop.permute.xlu1 %623  ;;  %v619_v58 = vpop.permute.xlu0 %618 }
  0xf2   : > { %v583_v61 = vpop.f32.mrf.mxu0 }
  0xf3   : > { %v605_v63 = vmax.f32 %v589_v59, 0.0  ;;  %v584_v0 = vadd.f32 %v583_v61, %v403_v49 }
  0xf5   : > { %v604_v3 = vmax.f32 %v584_v0, 0.0  ;;  %1017 = vmatpush3.msra.mxu1 %v605_v63  ;;  %v752_v63 = vld [vmem:[%s1381_s5] sm:$0x7]  ;;  %v757_v0 = vpop.permute.xlu1 %756 }
  0xf6   : > { %1018 = vmatprep.subr.mxu1 %v1126_v39 }
  0xf7   : > { %1019 = vmatpush3.msra.mxu1 %v604_v3 }
  0xf8   : > { %1020 = vmatprep.subr.mxu1 %v1126_v39 }
  0xf9   : > { %1021 = vmatpush3.msra.mxu1 %v603_v5 }
  0xfa   : > { %1022 = vmatprep.subr.mxu1 %v1126_v39 }
  0xfb   : > { %1023 = vmatpush3.msra.mxu1 %v602_v8 }
  0xfc   : > { %1024 = vmatprep.subr.mxu1 %v1126_v39 }
  0xfd   : > { %1025 = vmatpush3.msra.mxu1 %v601_v11 }
  0xfe   : > { %1026 = vmatprep.subr.mxu1 %v1126_v39 }
  0xff   : > { %1027 = vmatpush3.msra.mxu1 %v600_v13 }
 0x100   : > { %1028 = vmatprep.subr.mxu1 %v1126_v39 }
 0x101   : > { %1029 = vmatpush3.msra.mxu1 %v599_v16 }
 0x102   : > { %1030 = vmatprep.subr.mxu1 %v1126_v39 }
 0x103   : > { %1031 = vmatpush3.msra.mxu1 %v598_v19 }
 0x104   : > { %1032 = vmatprep.subr.mxu1 %v1126_v39 }
 0x105   : > { %1033 = vmatpush3.msra.mxu1 %v597_v21 }
 0x106   : > { %1034 = vmatprep.subr.mxu1 %v1126_v39 }
 0x107   : > { %1035 = vmatpush3.msra.mxu1 %v596_v24 }
 0x108   : > { %1036 = vmatprep.subr.mxu1 %v1126_v39 }
 0x109   : > { %1037 = vmatpush3.msra.mxu1 %v595_v27 }
 0x10a   : > { %1038 = vmatprep.subr.mxu1 %v1126_v39 }
 0x10b   : > { %1039 = vmatpush3.msra.mxu1 %v594_v29 }
 0x10c   : > { %1040 = vmatprep.subr.mxu1 %v1126_v39 }
 0x10d   : > { %1041 = vmatpush3.msra.mxu1 %v593_v30 }
 0x10e   : > { %1042 = vmatprep.subr.mxu1 %v1126_v39 }
 0x10f   : > { %1043 = vmatpush3.msra.mxu1 %v592_v31 }
 0x110   : > { %1045 = vmatmul.mubr.msk.f32.vlgmr.msra.gmra.mxu1 %vm641_vm3, %v606_v32 }
 0x111   : > { %1047 = vmatprep.mubr.msk.f32.mxu1 %vm1127_vm2, %v1126_v39 }
 0x114   : > { %1048 = vmatmul.mubr.msk.f32.gmra.mxu1 %vm641_vm3, %v607_v33 }
 0x115   : > { %1050 = vmatprep.mubr.msk.f32.mxu1 %vm1127_vm2, %v1126_v39 }
 0x118   : > { %1051 = vmatmul.mubr.msk.f32.gmra.mxu1 %vm641_vm3, %v608_v34 }
 0x119   : > { %1053 = vmatprep.mubr.msk.f32.mxu1 %vm1127_vm2, %v1126_v39 }
 0x11c   : > { %1054 = vmatmul.mubr.msk.f32.gmra.mxu1 %vm641_vm3, %v609_v35 }
 0x11d   : > { %1056 = vmatprep.mubr.msk.f32.mxu1 %vm1127_vm2, %v1126_v39 }
 0x120   : > { %1057 = vmatmul.mubr.msk.f32.gmra.mxu1 %vm641_vm3, %v610_v36 }
 0x1d0   : > { %v723_v37 = vpop.f32.mrf.mxu1 }
 0x1d1   : > { %v724_v59 = vadd.f32 %v723_v37, %v619_v58 }
 0x1d2   : > { %v1046_v38 = vpop.f32.mrf.mxu1 }
 0x1d3   : > { %v747_v62 = vmax.f32 %v724_v59, 0.0 }
 0x1d4   : > { %v728_v40 = vpop.f32.mrf.mxu1 }
 0x1d5   : > { %v729_v56 = vadd.f32 %v728_v40, %v624_v55 }
 0x1d6   : > { %v1049_v41 = vpop.f32.mrf.mxu1 }
 0x1d7   : > { %v748_v61 = vmax.f32 %v729_v56, 0.0 }
 0x1d8   : > { %v733_v42 = vpop.f32.mrf.mxu1 }
 0x1d9   : > { %v734_v53 = vadd.f32 %v733_v42, %v629_v48 }
 0x1da   : > { %v1052_v44 = vpop.f32.mrf.mxu1 }
 0x1db   : > { %v749_v60 = vmax.f32 %v734_v53, 0.0 }
 0x1dc   : > { %v738_v45 = vpop.f32.mrf.mxu1 }
 0x1dd   : > { %v739_v50 = vadd.f32 %v738_v45, %v634_v46 }
 0x1de   : > { %v1055_v47 = vpop.f32.mrf.mxu1 }
 0x1df   : > { %v750_v57 = vmax.f32 %v739_v50, 0.0 }
 0x1e0   : > { %v743_v49 = vpop.f32.mrf.mxu1 }
 0x1e1   : > { %v744_v51 = vadd.f32 %v743_v49, %v639_v43 }
 0x1e2   : > { %v1058_v52 = vpop.f32.mrf.mxu1 }
 0x1e3   : > { %v751_v54 = vmax.f32 %v744_v51, 0.0 }
 0x1e5   : > { %1060 = vmatpush3.msra.mxu0 %v751_v54 }
 0x1e6   : > { %1061 = vmatprep.subr.mxu0 %v1126_v39 }
 0x1e7   : > { %1062 = vmatpush3.msra.mxu0 %v750_v57 }
 0x1e8   : > { %1063 = vmatprep.subr.mxu0 %v1126_v39 }
 0x1e9   : > { %1064 = vmatpush3.msra.mxu0 %v749_v60 }
 0x1ea   : > { %1065 = vmatprep.subr.mxu0 %v1126_v39 }
 0x1eb   : > { %1066 = vmatpush3.msra.mxu0 %v748_v61 }
 0x1ec   : > { %1067 = vmatprep.subr.mxu0 %v1126_v39 }
 0x1ed   : > { %1068 = vmatpush3.msra.mxu0 %v747_v62 }
 0x1ee   : > { %1070 = vmatmul.mubr.msk.f32.vlgmr.msra.gmra.mxu0 %vm759_vm4, %v752_v63 }
 0x2ae   : > { %v829_v1 = vpop.f32.mrf.mxu0 }
 0x2af   : > { %v830_v2 = vadd.f32 %v829_v1, %v757_v0 }
 0x2b0   : > { %v1071_v3 = vpop.f32.mrf.mxu0 }
 0x2b1   : > { %v833_v4 = vmax.f32 %v830_v2, 0.0 }
 0x2b3   : > { %834 = vst [vmem:[%s307_s16] sm:$0x7] %v833_v4 }
 0x2b4 PF: > { %s17_s26 = sadd.s32 1, %s1123_s26   ;;  %s1384_s24 = smov %s1119_s25 }
 0x2b5   : > { %p14_p5 = scmp.ge.s32.totalorder %s17_s26, 4   ;;  %s1385_s25 = smov %s1387_s27 }
 0x2b7   :  { %16 = sbr.rel (!%p14_p5) target bundleno = 2 (0x2), region = 78 }

</bundles_post_ra>
